<compile_context>
chip_gen: v5e
topology: v5e:2x2
jax: 0.10.0
libtpu: 0.0.40
codegen_flags: <defaults>
</compile_context>

<pallas_src>
import functools

import jax
import jax.numpy as jnp
from jax.experimental import pallas as pl
from jax.experimental.pallas import tpu as pltpu


def _step_vmem_bytes(tile_ho, wo, c, act_bytes, out_bytes):
    """Estimated VMEM bytes for one grid step (double-buffered pipeline)."""
    wc = wo + 1
    main = 4 * 2 * tile_ho * wc * c * act_bytes   # 4 parity slabs
    bnd = 2 * 2 * 1 * wc * c * act_bytes          # 2 boundary rows
    wgt = 2 * 9 * c * c * act_bytes               # weights (double-buffered)
    bia = 2 * 1 * c * 4                           # f32 bias
    out = 2 * tile_ho * wo * c * out_bytes        # output tile
    acc = 2 * tile_ho * wo * c * 4                # local f32 accumulator + temps
    return main + bnd + wgt + bia + out + acc


def _pick_tile_ho(ho, wo, c, act_bytes, out_bytes, *,
                  max_rows=2048, vmem_budget=24 * 1024 * 1024):
    """Largest divisor of `ho` whose per-step buffers fit `vmem_budget` and
    whose GEMM M-dim stays <= max_rows.  Falls back to 1 (correct, slow)."""
    best = 1
    for d in range(1, ho + 1):
        if ho % d != 0:
            continue
        if (d * wo <= max_rows and
                _step_vmem_bytes(d, wo, c, act_bytes, out_bytes) <= vmem_budget):
            best = d
    return best


def _downsample_conv_kernel(ee_m_ref, ee_b_ref, eo_m_ref, eo_b_ref,
                            oe_m_ref, oo_m_ref, w_ref, b_ref, o_ref):
    """One (batch, output-row-tile) step of the stride-2 3x3 conv.

    Block shapes (TH = output-row tile, Wc = Wo + 1):
      ee/eo/oe/oo main : (1, TH, Wc, C)  even/odd-row x even/odd-col parity views
      ee/eo boundary   : (1, 1,  Wc, C)  first even row of the *next* tile
      w                : (3, 3, C, C)    (kh, kw, cin, cout), VMEM resident
      b                : (1, C)          float32
      o                : (1, TH, Wo, C)

    Tap mapping (output pixel (ho, wo), padded input xp[2ho+kh, 2wo+kw]):
      (0,0)=ee[ho,wo]   (0,1)=eo[ho,wo]   (0,2)=ee[ho,wo+1]
      (1,0)=oe[ho,wo]   (1,1)=oo[ho,wo]   (1,2)=oe[ho,wo+1]
      (2,0)=ee[ho+1,wo] (2,1)=eo[ho+1,wo] (2,2)=ee[ho+1,wo+1]
    """
    _, th, wo, c = o_ref.shape
    m = th * wo
    m1 = (th - 1) * wo

    def gemm(lhs2d, kh, kw):
        return jnp.dot(lhs2d, w_ref[kh, kw], preferred_element_type=jnp.float32)

    # Hoist the column-shifted (kw=2) views once per slab and reuse them.
    ee_sh = ee_m_ref[0, :, 1:wo + 1, :]          # (th, wo, c)
    oe_sh = oe_m_ref[0, :, 1:wo + 1, :]

    # kh = 0, 1 taps: six full (m, c) GEMMs accumulated in a local f32 value.
    # Bias broadcast folded into the first accumulate.
    acc = gemm(ee_m_ref[0, :, 0:wo, :].reshape(m, c), 0, 0) + b_ref[...]
    acc = acc + gemm(eo_m_ref[0, :, 0:wo, :].reshape(m, c), 0, 1)
    acc = acc + gemm(ee_sh.reshape(m, c), 0, 2)
    acc = acc + gemm(oe_m_ref[0, :, 0:wo, :].reshape(m, c), 1, 0)
    acc = acc + gemm(oo_m_ref[0, :, 0:wo, :].reshape(m, c), 1, 1)
    acc = acc + gemm(oe_sh.reshape(m, c), 1, 2)

    # kh = 2 taps need parity row ho+1: main-slab rows 1..th-1 for local output
    # rows 0..th-2, and the 1-row boundary block for the last local row.
    # Accumulate into disjoint row ranges — no slab-sized concatenate.
    bot = gemm(ee_b_ref[0, 0, 0:wo, :], 2, 0)
    bot = bot + gemm(eo_b_ref[0, 0, 0:wo, :], 2, 1)
    bot = bot + gemm(ee_b_ref[0, 0, 1:wo + 1, :], 2, 2)

    if th > 1:
        top = gemm(ee_m_ref[0, 1:th, 0:wo, :].reshape(m1, c), 2, 0)
        top = top + gemm(eo_m_ref[0, 1:th, 0:wo, :].reshape(m1, c), 2, 1)
        top = top + gemm(ee_sh[1:th].reshape(m1, c), 2, 2)
        out_top = (acc[0:m1] + top).reshape(th - 1, wo, c)
        out_bot = (acc[m1:m] + bot).reshape(1, wo, c)
        o_ref[0, 0:th - 1] = out_top.astype(o_ref.dtype)
        o_ref[0, th - 1:th] = out_bot.astype(o_ref.dtype)
    else:
        o_ref[0, 0] = (acc + bot).astype(o_ref.dtype)


def downsample_conv(x, weight, bias, *, compute_dtype=jnp.bfloat16,
                    out_dtype=None, tile_ho=None,
                    in_layout="NCHW", out_layout="NCHW"):
    """Downsample.forward with use_conv=True.

    x: (N, C, H, W) NCHW (or NHWC with in_layout="NHWC"), H and W even.
    weight: (C, C, 3, 3) OIHW.  bias: (C,).
    Returns (N, C, H//2, W//2) NCHW (or NHWC with out_layout="NHWC").
    GEMM operands are cast to compute_dtype (bf16 default, f32 accumulate).
    """
    if in_layout == "NCHW":
        N, C, H, W = x.shape
        x_nhwc = jnp.transpose(x, (0, 2, 3, 1))
    elif in_layout == "NHWC":
        N, H, W, C = x.shape
        x_nhwc = x
    else:
        raise ValueError(f"unknown in_layout {in_layout!r}")
    assert H % 2 == 0 and W % 2 == 0, "kernel assumes even spatial dims"
    Ho, Wo = H // 2, W // 2
    Wc = Wo + 1

    cdt = jnp.dtype(compute_dtype) if compute_dtype is not None else jnp.dtype(x.dtype)
    odt = jnp.dtype(out_dtype) if out_dtype is not None else jnp.dtype(x.dtype)

    # Transpose + cast + zero-pad + the four parity slices are all reads of x;
    # XLA fuses them into a small number of HBM passes.
    xp = jnp.pad(x_nhwc.astype(cdt), ((0, 0), (1, 1), (1, 1), (0, 0)))

    # Four parity views of the padded activation.  Every 3x3/stride-2 tap of
    # output pixel (ho, wo) is a unit-stride window of one of these.
    x_ee = xp[:, 0::2, 0::2, :]     # (N, Ho+1, Wc, C)
    x_eo = xp[:, 0::2, 1::2, :]
    x_oe = xp[:, 1::2, 0::2, :]
    x_oo = xp[:, 1::2, 1::2, :]

    # OIHW -> (kh, kw, cin, cout); cout on lanes.
    w = jnp.transpose(weight, (2, 3, 1, 0)).astype(cdt)
    b = bias.reshape(1, C).astype(jnp.float32)

    act_bytes = cdt.itemsize
    out_bytes = odt.itemsize
    if tile_ho is None:
        tile_ho = _pick_tile_ho(Ho, Wo, C, act_bytes, out_bytes)
    assert Ho % tile_ho == 0, (Ho, tile_ho)
    grid = (N, Ho // tile_ho)

    est = _step_vmem_bytes(tile_ho, Wo, C, act_bytes, out_bytes)
    vmem_limit = int(min(max(2 * est, 32 * 1024 * 1024), 56 * 1024 * 1024))

    main_spec = pl.BlockSpec((1, tile_ho, Wc, C), lambda n, t: (n, t, 0, 0))
    bnd_spec = pl.BlockSpec((1, 1, Wc, C),
                            lambda n, t: (n, (t + 1) * tile_ho, 0, 0))

    cost = pl.CostEstimate(
        flops=2 * N * Ho * Wo * 9 * C * C,
        transcendentals=0,
        bytes_accessed=(4 * N * (Ho + 1) * Wc * C + 9 * C * C) * act_bytes
        + N * Ho * Wo * C * out_bytes,
    )

    out_nhwc = pl.pallas_call(
        _downsample_conv_kernel,
        out_shape=jax.ShapeDtypeStruct((N, Ho, Wo, C), odt),
        grid_spec=pltpu.PrefetchScalarGridSpec(
            num_scalar_prefetch=0,
            grid=grid,
            in_specs=[
                main_spec,                                        # x_ee main
                bnd_spec,                                         # x_ee boundary
                main_spec,                                        # x_eo main
                bnd_spec,                                         # x_eo boundary
                main_spec,                                        # x_oe main
                main_spec,                                        # x_oo main
                pl.BlockSpec((3, 3, C, C), lambda n, t: (0, 0, 0, 0)),
                pl.BlockSpec((1, C), lambda n, t: (0, 0)),
            ],
            out_specs=pl.BlockSpec((1, tile_ho, Wo, C),
                                   lambda n, t: (n, t, 0, 0)),
        ),
        compiler_params=pltpu.CompilerParams(
            dimension_semantics=("parallel", "parallel"),
            vmem_limit_bytes=vmem_limit,
        ),
        cost_estimate=cost,
    )(x_ee, x_ee, x_eo, x_eo, x_oe, x_oo, w, b)

    if out_layout == "NHWC":
        return out_nhwc
    return jnp.transpose(out_nhwc, (0, 3, 1, 2))


if __name__ == "__main__":
    key = jax.random.PRNGKey(0)
    kx, kwt, kb = jax.random.split(key, 3)

    N, C, H, W = 2, 4, 16, 16
    x = jax.random.normal(kx, (N, C, H, W), dtype=jnp.float32)

    # deterministic Conv2d(C, C, 3, 3) params (PyTorch-style uniform bound)
    fan_in = C * 3 * 3
    bound = 1.0 / (fan_in ** 0.5)
    weight = jax.random.uniform(kwt, (C, C, 3, 3), jnp.float32, -bound, bound)
    bias = jax.random.uniform(kb, (C,), jnp.float32, -bound, bound)

    # reference: XLA conv matching PyTorch Conv2d(stride=2, padding=1)
    y_ref = jax.lax.conv_general_dilated(
        x, weight, window_strides=(2, 2), padding=((1, 1), (1, 1)),
        dimension_numbers=("NCHW", "OIHW", "NCHW"),
    ) + bias.reshape(1, C, 1, 1)

    # f32 GEMM operands (tight tolerance)
    fwd_f32 = jax.jit(functools.partial(downsample_conv, compute_dtype=jnp.float32))
    y = jax.block_until_ready(fwd_f32(x, weight, bias))
    assert y.shape == (N, C, H // 2, W // 2), y.shape
    assert jnp.allclose(y, y_ref, atol=1e-5, rtol=1e-5), \
        float(jnp.max(jnp.abs(y - y_ref)))

    # single-row tile path (th == 1 branch)
    fwd_t1 = jax.jit(functools.partial(downsample_conv, compute_dtype=jnp.float32,
                                       tile_ho=1))
    y_t1 = jax.block_until_ready(fwd_t1(x, weight, bias))
    assert jnp.allclose(y_t1, y_ref, atol=1e-5, rtol=1e-5), \
        float(jnp.max(jnp.abs(y_t1 - y_ref)))

    # default path: bf16 GEMM operands, f32 accumulate + bias (looser tolerance)
    fwd_bf16 = jax.jit(downsample_conv)
    y_bf = jax.block_until_ready(fwd_bf16(x, weight, bias))
    assert jnp.allclose(y_bf, y_ref, atol=1e-1, rtol=1e-1), \
        float(jnp.max(jnp.abs(y_bf - y_ref)))

    print("KERNEL_OK")
</pallas_src>

<mosaic_0001>
module attributes {stable_mosaic.version = 11 : i64} {
  func.func @_downsample_conv_kernel(%arg0: i32, %arg1: i32, %arg2: memref<1x8x9x4xf32, #tpu.memory_space<vmem>>, %arg3: memref<1x1x9x4xf32, #tpu.memory_space<vmem>>, %arg4: memref<1x8x9x4xf32, #tpu.memory_space<vmem>>, %arg5: memref<1x1x9x4xf32, #tpu.memory_space<vmem>>, %arg6: memref<1x8x9x4xf32, #tpu.memory_space<vmem>>, %arg7: memref<1x8x9x4xf32, #tpu.memory_space<vmem>>, %arg8: memref<3x3x4x4xf32, #tpu.memory_space<vmem>>, %arg9: memref<1x4xf32, #tpu.memory_space<vmem>>, %arg10: memref<1x8x8x4xf32, #tpu.memory_space<vmem>>) attributes {dimension_semantics = [#tpu.dimension_semantics<parallel>, #tpu.dimension_semantics<parallel>], iteration_bounds = array<i64: 2, 1>, scalar_prefetch = 0 : i64, scratch_operands = 0 : i64, tpu.core_type = #tpu.core_type<tc>, window_params = [{transform_indices = @transform_0, window_bounds = array<i64: 1, 8, 9, 4>}, {transform_indices = @transform_1, window_bounds = array<i64: 1, 1, 9, 4>}, {transform_indices = @transform_2, window_bounds = array<i64: 1, 8, 9, 4>}, {transform_indices = @transform_3, window_bounds = array<i64: 1, 1, 9, 4>}, {transform_indices = @transform_4, window_bounds = array<i64: 1, 8, 9, 4>}, {transform_indices = @transform_5, window_bounds = array<i64: 1, 8, 9, 4>}, {pipeline_mode = #tpu.pipeline_mode<synchronous>, transform_indices = @transform_6, window_bounds = array<i64: 3, 3, 4, 4>}, {pipeline_mode = #tpu.pipeline_mode<synchronous>, transform_indices = @transform_7, window_bounds = array<i64: 1, 4>}, {transform_indices = @transform_8, window_bounds = array<i64: 1, 8, 8, 4>}]} {
    %c0 = arith.constant 0 : index
    %c0_0 = arith.constant 0 : index
    %c1 = arith.constant 1 : index
    %c0_1 = arith.constant 0 : index
    %0 = vector.load %arg2[%c0, %c0_0, %c1, %c0_1] : memref<1x8x9x4xf32, #tpu.memory_space<vmem>>, vector<1x8x8x4xf32>
    %1 = vector.shape_cast %0 : vector<1x8x8x4xf32> to vector<8x8x4xf32>
    %c0_2 = arith.constant 0 : index
    %c0_3 = arith.constant 0 : index
    %c1_4 = arith.constant 1 : index
    %c0_5 = arith.constant 0 : index
    %2 = vector.load %arg6[%c0_2, %c0_3, %c1_4, %c0_5] : memref<1x8x9x4xf32, #tpu.memory_space<vmem>>, vector<1x8x8x4xf32>
    %3 = vector.shape_cast %2 : vector<1x8x8x4xf32> to vector<8x8x4xf32>
    %c0_6 = arith.constant 0 : index
    %c0_7 = arith.constant 0 : index
    %c0_8 = arith.constant 0 : index
    %c0_9 = arith.constant 0 : index
    %4 = vector.load %arg2[%c0_6, %c0_7, %c0_8, %c0_9] : memref<1x8x9x4xf32, #tpu.memory_space<vmem>>, vector<1x8x8x4xf32>
    %5 = vector.shape_cast %4 : vector<1x8x8x4xf32> to vector<8x8x4xf32>
    %6 = vector.shape_cast %5 : vector<8x8x4xf32> to vector<64x4xf32>
    %c0_10 = arith.constant 0 : index
    %c0_11 = arith.constant 0 : index
    %c0_12 = arith.constant 0 : index
    %c0_13 = arith.constant 0 : index
    %7 = vector.load %arg8[%c0_10, %c0_11, %c0_12, %c0_13] : memref<3x3x4x4xf32, #tpu.memory_space<vmem>>, vector<1x1x4x4xf32>
    %8 = vector.shape_cast %7 : vector<1x1x4x4xf32> to vector<4x4xf32>
    %cst = arith.constant dense<0.000000e+00> : vector<64x4xf32>
    %9 = tpu.matmul %6, %8, %cst {dimension_numbers = #tpu.dot_dimension_numbers<[1], [0], [0], [1], [0, 0, 1, 1], [], []>} : vector<64x4xf32>, vector<4x4xf32>, vector<64x4xf32> -> vector<64x4xf32>
    %c0_14 = arith.constant 0 : index
    %c0_15 = arith.constant 0 : index
    %10 = vector.load %arg9[%c0_14, %c0_15] : memref<1x4xf32, #tpu.memory_space<vmem>>, vector<1x4xf32>
    %11 = vector.broadcast %10 : vector<1x4xf32> to vector<64x4xf32>
    %12 = arith.addf %9, %11 : vector<64x4xf32>
    %c0_16 = arith.constant 0 : index
    %c0_17 = arith.constant 0 : index
    %c0_18 = arith.constant 0 : index
    %c0_19 = arith.constant 0 : index
    %13 = vector.load %arg4[%c0_16, %c0_17, %c0_18, %c0_19] : memref<1x8x9x4xf32, #tpu.memory_space<vmem>>, vector<1x8x8x4xf32>
    %14 = vector.shape_cast %13 : vector<1x8x8x4xf32> to vector<8x8x4xf32>
    %15 = vector.shape_cast %14 : vector<8x8x4xf32> to vector<64x4xf32>
    %c0_20 = arith.constant 0 : index
    %c1_21 = arith.constant 1 : index
    %c0_22 = arith.constant 0 : index
    %c0_23 = arith.constant 0 : index
    %16 = vector.load %arg8[%c0_20, %c1_21, %c0_22, %c0_23] : memref<3x3x4x4xf32, #tpu.memory_space<vmem>>, vector<1x1x4x4xf32>
    %17 = vector.shape_cast %16 : vector<1x1x4x4xf32> to vector<4x4xf32>
    %cst_24 = arith.constant dense<0.000000e+00> : vector<64x4xf32>
    %18 = tpu.matmul %15, %17, %cst_24 {dimension_numbers = #tpu.dot_dimension_numbers<[1], [0], [0], [1], [0, 0, 1, 1], [], []>} : vector<64x4xf32>, vector<4x4xf32>, vector<64x4xf32> -> vector<64x4xf32>
    %19 = arith.addf %12, %18 : vector<64x4xf32>
    %20 = vector.shape_cast %1 : vector<8x8x4xf32> to vector<64x4xf32>
    %c0_25 = arith.constant 0 : index
    %c2 = arith.constant 2 : index
    %c0_26 = arith.constant 0 : index
    %c0_27 = arith.constant 0 : index
    %21 = vector.load %arg8[%c0_25, %c2, %c0_26, %c0_27] : memref<3x3x4x4xf32, #tpu.memory_space<vmem>>, vector<1x1x4x4xf32>
    %22 = vector.shape_cast %21 : vector<1x1x4x4xf32> to vector<4x4xf32>
    %cst_28 = arith.constant dense<0.000000e+00> : vector<64x4xf32>
    %23 = tpu.matmul %20, %22, %cst_28 {dimension_numbers = #tpu.dot_dimension_numbers<[1], [0], [0], [1], [0, 0, 1, 1], [], []>} : vector<64x4xf32>, vector<4x4xf32>, vector<64x4xf32> -> vector<64x4xf32>
    %24 = arith.addf %19, %23 : vector<64x4xf32>
    %c0_29 = arith.constant 0 : index
    %c0_30 = arith.constant 0 : index
    %c0_31 = arith.constant 0 : index
    %c0_32 = arith.constant 0 : index
    %25 = vector.load %arg6[%c0_29, %c0_30, %c0_31, %c0_32] : memref<1x8x9x4xf32, #tpu.memory_space<vmem>>, vector<1x8x8x4xf32>
    %26 = vector.shape_cast %25 : vector<1x8x8x4xf32> to vector<8x8x4xf32>
    %27 = vector.shape_cast %26 : vector<8x8x4xf32> to vector<64x4xf32>
    %c1_33 = arith.constant 1 : index
    %c0_34 = arith.constant 0 : index
    %c0_35 = arith.constant 0 : index
    %c0_36 = arith.constant 0 : index
    %28 = vector.load %arg8[%c1_33, %c0_34, %c0_35, %c0_36] : memref<3x3x4x4xf32, #tpu.memory_space<vmem>>, vector<1x1x4x4xf32>
    %29 = vector.shape_cast %28 : vector<1x1x4x4xf32> to vector<4x4xf32>
    %cst_37 = arith.constant dense<0.000000e+00> : vector<64x4xf32>
    %30 = tpu.matmul %27, %29, %cst_37 {dimension_numbers = #tpu.dot_dimension_numbers<[1], [0], [0], [1], [0, 0, 1, 1], [], []>} : vector<64x4xf32>, vector<4x4xf32>, vector<64x4xf32> -> vector<64x4xf32>
    %31 = arith.addf %24, %30 : vector<64x4xf32>
    %c0_38 = arith.constant 0 : index
    %c0_39 = arith.constant 0 : index
    %c0_40 = arith.constant 0 : index
    %c0_41 = arith.constant 0 : index
    %32 = vector.load %arg7[%c0_38, %c0_39, %c0_40, %c0_41] : memref<1x8x9x4xf32, #tpu.memory_space<vmem>>, vector<1x8x8x4xf32>
    %33 = vector.shape_cast %32 : vector<1x8x8x4xf32> to vector<8x8x4xf32>
    %34 = vector.shape_cast %33 : vector<8x8x4xf32> to vector<64x4xf32>
    %c1_42 = arith.constant 1 : index
    %c1_43 = arith.constant 1 : index
    %c0_44 = arith.constant 0 : index
    %c0_45 = arith.constant 0 : index
    %35 = vector.load %arg8[%c1_42, %c1_43, %c0_44, %c0_45] : memref<3x3x4x4xf32, #tpu.memory_space<vmem>>, vector<1x1x4x4xf32>
    %36 = vector.shape_cast %35 : vector<1x1x4x4xf32> to vector<4x4xf32>
    %cst_46 = arith.constant dense<0.000000e+00> : vector<64x4xf32>
    %37 = tpu.matmul %34, %36, %cst_46 {dimension_numbers = #tpu.dot_dimension_numbers<[1], [0], [0], [1], [0, 0, 1, 1], [], []>} : vector<64x4xf32>, vector<4x4xf32>, vector<64x4xf32> -> vector<64x4xf32>
    %38 = arith.addf %31, %37 : vector<64x4xf32>
    %39 = vector.shape_cast %3 : vector<8x8x4xf32> to vector<64x4xf32>
    %c1_47 = arith.constant 1 : index
    %c2_48 = arith.constant 2 : index
    %c0_49 = arith.constant 0 : index
    %c0_50 = arith.constant 0 : index
    %40 = vector.load %arg8[%c1_47, %c2_48, %c0_49, %c0_50] : memref<3x3x4x4xf32, #tpu.memory_space<vmem>>, vector<1x1x4x4xf32>
    %41 = vector.shape_cast %40 : vector<1x1x4x4xf32> to vector<4x4xf32>
    %cst_51 = arith.constant dense<0.000000e+00> : vector<64x4xf32>
    %42 = tpu.matmul %39, %41, %cst_51 {dimension_numbers = #tpu.dot_dimension_numbers<[1], [0], [0], [1], [0, 0, 1, 1], [], []>} : vector<64x4xf32>, vector<4x4xf32>, vector<64x4xf32> -> vector<64x4xf32>
    %43 = arith.addf %38, %42 : vector<64x4xf32>
    %c0_52 = arith.constant 0 : index
    %c0_53 = arith.constant 0 : index
    %c0_54 = arith.constant 0 : index
    %c0_55 = arith.constant 0 : index
    %44 = vector.load %arg3[%c0_52, %c0_53, %c0_54, %c0_55] : memref<1x1x9x4xf32, #tpu.memory_space<vmem>>, vector<1x1x8x4xf32>
    %45 = vector.shape_cast %44 : vector<1x1x8x4xf32> to vector<8x4xf32>
    %c2_56 = arith.constant 2 : index
    %c0_57 = arith.constant 0 : index
    %c0_58 = arith.constant 0 : index
    %c0_59 = arith.constant 0 : index
    %46 = vector.load %arg8[%c2_56, %c0_57, %c0_58, %c0_59] : memref<3x3x4x4xf32, #tpu.memory_space<vmem>>, vector<1x1x4x4xf32>
    %47 = vector.shape_cast %46 : vector<1x1x4x4xf32> to vector<4x4xf32>
    %cst_60 = arith.constant dense<0.000000e+00> : vector<8x4xf32>
    %48 = tpu.matmul %45, %47, %cst_60 {dimension_numbers = #tpu.dot_dimension_numbers<[1], [0], [0], [1], [0, 0, 1, 1], [], []>} : vector<8x4xf32>, vector<4x4xf32>, vector<8x4xf32> -> vector<8x4xf32>
    %c0_61 = arith.constant 0 : index
    %c0_62 = arith.constant 0 : index
    %c0_63 = arith.constant 0 : index
    %c0_64 = arith.constant 0 : index
    %49 = vector.load %arg5[%c0_61, %c0_62, %c0_63, %c0_64] : memref<1x1x9x4xf32, #tpu.memory_space<vmem>>, vector<1x1x8x4xf32>
    %50 = vector.shape_cast %49 : vector<1x1x8x4xf32> to vector<8x4xf32>
    %c2_65 = arith.constant 2 : index
    %c1_66 = arith.constant 1 : index
    %c0_67 = arith.constant 0 : index
    %c0_68 = arith.constant 0 : index
    %51 = vector.load %arg8[%c2_65, %c1_66, %c0_67, %c0_68] : memref<3x3x4x4xf32, #tpu.memory_space<vmem>>, vector<1x1x4x4xf32>
    %52 = vector.shape_cast %51 : vector<1x1x4x4xf32> to vector<4x4xf32>
    %cst_69 = arith.constant dense<0.000000e+00> : vector<8x4xf32>
    %53 = tpu.matmul %50, %52, %cst_69 {dimension_numbers = #tpu.dot_dimension_numbers<[1], [0], [0], [1], [0, 0, 1, 1], [], []>} : vector<8x4xf32>, vector<4x4xf32>, vector<8x4xf32> -> vector<8x4xf32>
    %54 = arith.addf %48, %53 : vector<8x4xf32>
    %c0_70 = arith.constant 0 : index
    %c0_71 = arith.constant 0 : index
    %c1_72 = arith.constant 1 : index
    %c0_73 = arith.constant 0 : index
    %55 = vector.load %arg3[%c0_70, %c0_71, %c1_72, %c0_73] : memref<1x1x9x4xf32, #tpu.memory_space<vmem>>, vector<1x1x8x4xf32>
    %56 = vector.shape_cast %55 : vector<1x1x8x4xf32> to vector<8x4xf32>
    %c2_74 = arith.constant 2 : index
    %c2_75 = arith.constant 2 : index
    %c0_76 = arith.constant 0 : index
    %c0_77 = arith.constant 0 : index
    %57 = vector.load %arg8[%c2_74, %c2_75, %c0_76, %c0_77] : memref<3x3x4x4xf32, #tpu.memory_space<vmem>>, vector<1x1x4x4xf32>
    %58 = vector.shape_cast %57 : vector<1x1x4x4xf32> to vector<4x4xf32>
    %cst_78 = arith.constant dense<0.000000e+00> : vector<8x4xf32>
    %59 = tpu.matmul %56, %58, %cst_78 {dimension_numbers = #tpu.dot_dimension_numbers<[1], [0], [0], [1], [0, 0, 1, 1], [], []>} : vector<8x4xf32>, vector<4x4xf32>, vector<8x4xf32> -> vector<8x4xf32>
    %60 = arith.addf %54, %59 : vector<8x4xf32>
    %c0_79 = arith.constant 0 : index
    %c1_80 = arith.constant 1 : index
    %c0_81 = arith.constant 0 : index
    %c0_82 = arith.constant 0 : index
    %61 = vector.load %arg2[%c0_79, %c1_80, %c0_81, %c0_82] : memref<1x8x9x4xf32, #tpu.memory_space<vmem>>, vector<1x7x8x4xf32>
    %62 = vector.shape_cast %61 : vector<1x7x8x4xf32> to vector<7x8x4xf32>
    %63 = vector.shape_cast %62 : vector<7x8x4xf32> to vector<56x4xf32>
    %c2_83 = arith.constant 2 : index
    %c0_84 = arith.constant 0 : index
    %c0_85 = arith.constant 0 : index
    %c0_86 = arith.constant 0 : index
    %64 = vector.load %arg8[%c2_83, %c0_84, %c0_85, %c0_86] : memref<3x3x4x4xf32, #tpu.memory_space<vmem>>, vector<1x1x4x4xf32>
    %65 = vector.shape_cast %64 : vector<1x1x4x4xf32> to vector<4x4xf32>
    %cst_87 = arith.constant dense<0.000000e+00> : vector<56x4xf32>
    %66 = tpu.matmul %63, %65, %cst_87 {dimension_numbers = #tpu.dot_dimension_numbers<[1], [0], [0], [1], [0, 0, 1, 1], [], []>} : vector<56x4xf32>, vector<4x4xf32>, vector<56x4xf32> -> vector<56x4xf32>
    %c0_88 = arith.constant 0 : index
    %c1_89 = arith.constant 1 : index
    %c0_90 = arith.constant 0 : index
    %c0_91 = arith.constant 0 : index
    %67 = vector.load %arg4[%c0_88, %c1_89, %c0_90, %c0_91] : memref<1x8x9x4xf32, #tpu.memory_space<vmem>>, vector<1x7x8x4xf32>
    %68 = vector.shape_cast %67 : vector<1x7x8x4xf32> to vector<7x8x4xf32>
    %69 = vector.shape_cast %68 : vector<7x8x4xf32> to vector<56x4xf32>
    %c2_92 = arith.constant 2 : index
    %c1_93 = arith.constant 1 : index
    %c0_94 = arith.constant 0 : index
    %c0_95 = arith.constant 0 : index
    %70 = vector.load %arg8[%c2_92, %c1_93, %c0_94, %c0_95] : memref<3x3x4x4xf32, #tpu.memory_space<vmem>>, vector<1x1x4x4xf32>
    %71 = vector.shape_cast %70 : vector<1x1x4x4xf32> to vector<4x4xf32>
    %cst_96 = arith.constant dense<0.000000e+00> : vector<56x4xf32>
    %72 = tpu.matmul %69, %71, %cst_96 {dimension_numbers = #tpu.dot_dimension_numbers<[1], [0], [0], [1], [0, 0, 1, 1], [], []>} : vector<56x4xf32>, vector<4x4xf32>, vector<56x4xf32> -> vector<56x4xf32>
    %73 = arith.addf %66, %72 : vector<56x4xf32>
    %74 = vector.extract_strided_slice %1 {offsets = [1, 0, 0], sizes = [7, 8, 4], strides = [1, 1, 1]} : vector<8x8x4xf32> to vector<7x8x4xf32>
    %75 = vector.shape_cast %74 : vector<7x8x4xf32> to vector<56x4xf32>
    %c2_97 = arith.constant 2 : index
    %c2_98 = arith.constant 2 : index
    %c0_99 = arith.constant 0 : index
    %c0_100 = arith.constant 0 : index
    %76 = vector.load %arg8[%c2_97, %c2_98, %c0_99, %c0_100] : memref<3x3x4x4xf32, #tpu.memory_space<vmem>>, vector<1x1x4x4xf32>
    %77 = vector.shape_cast %76 : vector<1x1x4x4xf32> to vector<4x4xf32>
    %cst_101 = arith.constant dense<0.000000e+00> : vector<56x4xf32>
    %78 = tpu.matmul %75, %77, %cst_101 {dimension_numbers = #tpu.dot_dimension_numbers<[1], [0], [0], [1], [0, 0, 1, 1], [], []>} : vector<56x4xf32>, vector<4x4xf32>, vector<56x4xf32> -> vector<56x4xf32>
    %79 = arith.addf %73, %78 : vector<56x4xf32>
    %80 = vector.extract_strided_slice %43 {offsets = [0, 0], sizes = [56, 4], strides = [1, 1]} : vector<64x4xf32> to vector<56x4xf32>
    %81 = arith.addf %80, %79 : vector<56x4xf32>
    %82 = vector.shape_cast %81 : vector<56x4xf32> to vector<7x8x4xf32>
    %83 = vector.extract_strided_slice %43 {offsets = [56, 0], sizes = [8, 4], strides = [1, 1]} : vector<64x4xf32> to vector<8x4xf32>
    %84 = arith.addf %83, %60 : vector<8x4xf32>
    %85 = vector.shape_cast %84 : vector<8x4xf32> to vector<1x8x4xf32>
    %c0_102 = arith.constant 0 : index
    %c0_103 = arith.constant 0 : index
    %c0_104 = arith.constant 0 : index
    %c0_105 = arith.constant 0 : index
    %86 = vector.load %arg10[%c0_102, %c0_103, %c0_104, %c0_105] : memref<1x8x8x4xf32, #tpu.memory_space<vmem>>, vector<1x7x8x4xf32>
    %87 = vector.shape_cast %86 : vector<1x7x8x4xf32> to vector<7x8x4xf32>
    %88 = vector.shape_cast %82 : vector<7x8x4xf32> to vector<1x7x8x4xf32>
    tpu.vector_store %arg10[%c0_102, %c0_103, %c0_104, %c0_105], %88 {strides = array<i32>} : memref<1x8x8x4xf32, #tpu.memory_space<vmem>>, vector<1x7x8x4xf32>,
    %c0_106 = arith.constant 0 : index
    %c7 = arith.constant 7 : index
    %c0_107 = arith.constant 0 : index
    %c0_108 = arith.constant 0 : index
    %89 = vector.load %arg10[%c0_106, %c7, %c0_107, %c0_108] : memref<1x8x8x4xf32, #tpu.memory_space<vmem>>, vector<1x1x8x4xf32>
    %90 = vector.shape_cast %89 : vector<1x1x8x4xf32> to vector<1x8x4xf32>
    %91 = vector.shape_cast %85 : vector<1x8x4xf32> to vector<1x1x8x4xf32>
    tpu.vector_store %arg10[%c0_106, %c7, %c0_107, %c0_108], %91 {strides = array<i32>} : memref<1x8x8x4xf32, #tpu.memory_space<vmem>>, vector<1x1x8x4xf32>,
    return
  }
  func.func @transform_0(%arg0: i32, %arg1: i32) -> (i32, i32, i32, i32) {
    %c0_i32 = arith.constant 0 : i32
    %c0_i32_0 = arith.constant 0 : i32
    %c0_i32_1 = arith.constant 0 : i32
    return %arg0, %arg1, %c0_i32, %c0_i32_0 : i32, i32, i32, i32
  }
  func.func @transform_1(%arg0: i32, %arg1: i32) -> (i32, i32, i32, i32) {
    %c1_i32 = arith.constant 1 : i32
    %0 = arith.addi %arg1, %c1_i32 : i32
    %c8_i32 = arith.constant 8 : i32
    %1 = arith.muli %0, %c8_i32 : i32
    %c0_i32 = arith.constant 0 : i32
    %c0_i32_0 = arith.constant 0 : i32
    %c0_i32_1 = arith.constant 0 : i32
    return %arg0, %1, %c0_i32, %c0_i32_0 : i32, i32, i32, i32
  }
  func.func @transform_2(%arg0: i32, %arg1: i32) -> (i32, i32, i32, i32) {
    %c0_i32 = arith.constant 0 : i32
    %c0_i32_0 = arith.constant 0 : i32
    %c0_i32_1 = arith.constant 0 : i32
    return %arg0, %arg1, %c0_i32, %c0_i32_0 : i32, i32, i32, i32
  }
  func.func @transform_3(%arg0: i32, %arg1: i32) -> (i32, i32, i32, i32) {
    %c1_i32 = arith.constant 1 : i32
    %0 = arith.addi %arg1, %c1_i32 : i32
    %c8_i32 = arith.constant 8 : i32
    %1 = arith.muli %0, %c8_i32 : i32
    %c0_i32 = arith.constant 0 : i32
    %c0_i32_0 = arith.constant 0 : i32
    %c0_i32_1 = arith.constant 0 : i32
    return %arg0, %1, %c0_i32, %c0_i32_0 : i32, i32, i32, i32
  }
  func.func @transform_4(%arg0: i32, %arg1: i32) -> (i32, i32, i32, i32) {
    %c0_i32 = arith.constant 0 : i32
    %c0_i32_0 = arith.constant 0 : i32
    %c0_i32_1 = arith.constant 0 : i32
    return %arg0, %arg1, %c0_i32, %c0_i32_0 : i32, i32, i32, i32
  }
  func.func @transform_5(%arg0: i32, %arg1: i32) -> (i32, i32, i32, i32) {
    %c0_i32 = arith.constant 0 : i32
    %c0_i32_0 = arith.constant 0 : i32
    %c0_i32_1 = arith.constant 0 : i32
    return %arg0, %arg1, %c0_i32, %c0_i32_0 : i32, i32, i32, i32
  }
  func.func @transform_6(%arg0: i32, %arg1: i32) -> (i32, i32, i32, i32) {
    %c0_i32 = arith.constant 0 : i32
    %c0_i32_0 = arith.constant 0 : i32
    %c0_i32_1 = arith.constant 0 : i32
    %c0_i32_2 = arith.constant 0 : i32
    %c0_i32_3 = arith.constant 0 : i32
    return %c0_i32, %c0_i32_0, %c0_i32_1, %c0_i32_2 : i32, i32, i32, i32
  }
  func.func @transform_7(%arg0: i32, %arg1: i32) -> (i32, i32) {
    %c0_i32 = arith.constant 0 : i32
    %c0_i32_0 = arith.constant 0 : i32
    %c0_i32_1 = arith.constant 0 : i32
    return %c0_i32, %c0_i32_0 : i32, i32
  }
  func.func @transform_8(%arg0: i32, %arg1: i32) -> (i32, i32, i32, i32) {
    %c0_i32 = arith.constant 0 : i32
    %c0_i32_0 = arith.constant 0 : i32
    %c0_i32_1 = arith.constant 0 : i32
    return %arg0, %arg1, %c0_i32, %c0_i32_0 : i32, i32, i32, i32
  }
}

</mosaic_0001>

<bundles_post_ra>
// kernel: downsample_conv.1
= control target key start
LH: loop header
LB: loop body
LE: loop exit
PB: predicated region body
PF: predicated region fallthrough
CT: control target
= control target key end

     0   :  { %s1880_s27 = smov 0   ;;  %s1882_s28 = smov 0   ;;  %s2254_s0 = inlined_call_operand.vmem [shape: f32[2,9,9,4], index: 0, kind: input, shape index: {}, may-alias: {0,1}]   ;;  %s2255_s1 = inlined_call_operand.vmem [shape: f32[2,9,9,4], index: 1, kind: input, shape index: {}, may-alias: {0,1}]   ;;  %s2256_s2 = inlined_call_operand.vmem [shape: f32[2,9,9,4], index: 2, kind: input, shape index: {}, may-alias: {2,3}]   ;;  %s2257_s3 = inlined_call_operand.vmem [shape: f32[2,9,9,4], index: 3, kind: input, shape index: {}, may-alias: {2,3}]   ;;  %s2258_s4 = inlined_call_operand.vmem [shape: f32[2,9,9,4], index: 4, kind: input, shape index: {}]   ;;  %s2259_s5 = inlined_call_operand.vmem [shape: f32[2,9,9,4], index: 5, kind: input, shape index: {}]   ;;  %s2260_s6 = inlined_call_operand.vmem [shape: f32[3,3,4,4], index: 6, kind: input, shape index: {}]   ;;  %s2261_s7 = inlined_call_operand.vmem [shape: f32[1,4], index: 7, kind: input, shape index: {}]   ;;  %s2262_s8 = inlined_call_operand.vmem [shape: f32[2,8,8,4], index: 8, kind: output, shape index: {}]  }
   0x1   :  { %s1884_s29 = smov 0  }
   0x2 LB: > { %s30_s30 = sadd.s32 1, %s1829_s28  ;;  %p1657_p0 = scmp.ge.s32.totalorder %s1833_s29, 1  ;;  %s1833_s29 = sphi %s1884_s29, %s18_s29   ;;  %s1829_s28 = sphi %s1882_s28, %s2264_s28   ;;  %s1825_s27 = sphi %s1880_s27, %s2263_s27  }
   0x3   : > { %p32_p1 = scmp.ge.s32.totalorder %s30_s30, 2  ;;  %p426_p2 = scmp.lt.s32.totalorder %s1833_s29, 3 }
   0x5   : > { %s2266_s30 = smov (%p32_p1, %s30_s30), 0  ;;  %p427_p3 = pnand %p1657_p0, %p426_p2 }
   0x6   : > { %p547_p4 = scmp.lt.s32.totalorder (!%p427_p3), %s1825_s27, 1 }
   0x7   : > { %430 = sbr.rel (%p427_p3) target bundleno = 294 (0x126), region = 52 }
   0xc   : > { %v685_v0 = vld [vmem:[%s2260_s6] sm:$0xf]  ;;  %vm715_vm0 = vcmask 1043456   ;;  %v1685_v1 = vld [vmem:[%s2260_s6 + $0x8] sm:$0xf]  ;;  %s2268_s27 = smov (!%p547_p4, %s1825_s27), 1 }
   0xd   : > { %1666 = vmatpush.msk.msra.mxu0 %vm715_vm0, %v685_v0  ;;  %1780 = vmatpush.msk.msra.mxu1 %vm715_vm0, %v685_v0  ;;  %v1695_v2 = vld [vmem:[%s2260_s6 + $0xc] sm:$0xf]  ;;  %v1675_v3 = vld [vmem:[%s2260_s6 + $0x4] sm:$0xf]  ;;  %v1705_v4 = vld [vmem:[%s2260_s6 + $0x10] sm:$0xf] }
   0xe   : > { %1781 = vmatpush.msk.msra.mxu2 %vm715_vm0, %v685_v0  ;;  %1782 = vmatpush.msk.msra.mxu3 %vm715_vm0, %v685_v0  ;;  %s1922_s19 = smul.u32 144, %s2268_s27  ;;  %vm690_vm1 = vcmask 31744   ;;  %v1726_v5 = vld [vmem:[%s2260_s6 + $0x1c] sm:$0xf]  ;;  %v1938_v6 = vld [vmem:[%s2260_s6 + $0x18] sm:$0xf] }
   0xf   : > { %1676 = vmatpush.msk.msrb.mxu1 %vm715_vm0, %v1675_v3  ;;  %1706 = vmatpush.msk.msrb.mxu0 %vm715_vm0, %v1705_v4  ;;  %v1715_v11 = vld [vmem:[%s2260_s6 + $0x14] sm:$0xf]  ;;  %v1731_v14 = vld [vmem:[%s2260_s6 + $0x20] sm:$0xf]  ;;  %s1779_s13 = sshll.u32 %s2268_s27, 6 }
  0x10   : > { %1686 = vmatpush.msk.msrb.mxu2 %vm715_vm0, %v1685_v1  ;;  %1696 = vmatpush.msk.msrb.mxu3 %vm715_vm0, %v1695_v2  ;;  %s1930_s22 = scalar_lea.vmem %s2254_s0, %s1922_s19  ;;  %s1989_s15 = scalar_lea.vmem %s2256_s2, %s1922_s19  ;;  %v2171_v2 = vld [vmem:[%s2261_s7] ss:$0 sm:$0xff] }
  0x11   : > { %v677_v7 = vld [vmem:[%s1930_s22] sm:$0xff]  ;;  %v1942_v8 = vld [vmem:[%s1930_s22 + $0x30] sm:$0xff]  ;;  %s1996_s18 = scalar_lea.vmem %s2258_s4, %s1922_s19  ;;  %s2016_s23 = scalar_lea.vmem %s2259_s5, %s1922_s19 }
  0x12   : > { %v1945_v9 = vld [vmem:[%s1930_s22 + $0x50] sm:$0xff]  ;;  %1667 = vmatmul.msk.f32.vlgmr.msra.gmra.mxu0 %vm690_vm1, %v677_v7  ;;  %1670 = vmatmul.msk.f32.vlgmr.msra.gmra.mxu1 %vm690_vm1, %v1942_v8  ;;  %v1951_v10 = vld [vmem:[%s1930_s22 + $0x60] sm:$0xff]  ;;  %s1776_s24 = sadd.s32 128, %s1922_s19  ;;  %s2212_s16 = scalar_lea.vmem %s2262_s8, %s1779_s13 }
  0x13   : > { %1672 = vmatmul.msk.f32.vlgmr.msra.gmra.mxu2 %vm690_vm1, %v1945_v9  ;;  %1673 = vmatmul.msk.f32.vlgmr.msra.gmra.mxu3 %vm690_vm1, %v1951_v10  ;;  %v1965_v12 = vld [vmem:[%s1930_s22 + $0x10] sm:$0xff]  ;;  %v1968_v13 = vld [vmem:[%s1930_s22 + $0x40] sm:$0xff]  ;;  %s606_s9 = scalar_lea.vmem %s2257_s3, %s1776_s24  ;;  %s572_s10 = scalar_lea.vmem %s2255_s1, %s1776_s24 }
  0x14   : > { %1727 = vmatpush.msk.msra.mxu2 %vm715_vm0, %v1726_v5  ;;  %1729 = vmatpush.msk.msra.mxu3 %vm715_vm0, %v1938_v6  ;;  %v1974_v15 = vld [vmem:[%s1930_s22 + $0x70] sm:$0xff]  ;;  %v661_v16 = vld [vmem:[%s1930_s22 + $0x1] sm:$0xff] }
  0x15   : > { %1716 = vmatpush.msk.msra.mxu1 %vm715_vm0, %v1715_v11  ;;  %1764 = vmatpush.msk.msra.mxu0 %vm715_vm0, %v1731_v14  ;;  %v1999_v17 = vld [vmem:[%s1930_s22 + $0x20] sm:$0xff]  ;;  %v2003_v19 = vld [vmem:[%s1930_s22 + $0x11] sm:$0xff] }
  0x16   : > { %v760_v18 = vld [vmem:[%s1989_s15] sm:$0xff]  ;;  %v2020_v21 = vld [vmem:[%s1989_s15 + $0x10] sm:$0xff] }
  0x17   : > { %v924_v20 = vld [vmem:[%s1996_s18] sm:$0xff]  ;;  %v925_v24 = vld [vmem:[%s1996_s18 + $0x10] sm:$0xff] }
  0x18   : > { %v1010_v22 = vld [vmem:[%s2016_s23] sm:$0xff]  ;;  %v1011_v26 = vld [vmem:[%s2016_s23 + $0x10] sm:$0xff] }
  0x19   : > { %v2024_v23 = vld [vmem:[%s1930_s22 + $0x21] sm:$0xff]  ;;  %v2038_v27 = vld [vmem:[%s1930_s22 + $0x31] sm:$0xff] }
  0x1a   : > { %1668 = vmatmul.msk.f32.gmra.mxu0 %vm690_vm1, %v1965_v12  ;;  %1671 = vmatmul.msk.f32.gmra.mxu1 %vm690_vm1, %v1968_v13  ;;  %v2034_v25 = vld [vmem:[%s1989_s15 + $0x20] sm:$0xff]  ;;  %v2048_v29 = vld [vmem:[%s1989_s15 + $0x30] sm:$0xff] }
  0x1b   : > { %1674 = vmatmul.msk.f32.gmra.mxu3 %vm690_vm1, %v1974_v15  ;;  %1687 = vmatmul.msk.f32.vlgmr.msrb.gmra.mxu2 %vm690_vm1, %v661_v16  ;;  %v926_v28 = vld [vmem:[%s1996_s18 + $0x20] sm:$0xff]  ;;  %v927_v32 = vld [vmem:[%s1996_s18 + $0x30] sm:$0xff] }
  0x1c   : > { %1732 = vmatpush.msk.msrb.mxu2 %vm715_vm0, %v1731_v14  ;;  %v1012_v30 = vld [vmem:[%s2016_s23 + $0x20] sm:$0xff]  ;;  %v1013_v34 = vld [vmem:[%s2016_s23 + $0x30] sm:$0xff] }
  0x1d   : > { %v2052_v31 = vld [vmem:[%s1930_s22 + $0x41] sm:$0xff]  ;;  %v2064_v35 = vld [vmem:[%s1930_s22 + $0x51] sm:$0xff] }
  0x1e   : > { %v764_v33 = vld [vmem:[%s1989_s15 + $0x40] sm:$0xff]  ;;  %v765_v37 = vld [vmem:[%s1989_s15 + $0x50] sm:$0xff] }
  0x1f   : > { %v928_v36 = vld [vmem:[%s1996_s18 + $0x40] sm:$0xff]  ;;  %v929_v40 = vld [vmem:[%s1996_s18 + $0x50] sm:$0xff] }
  0x20   : > { %v1014_v38 = vld [vmem:[%s2016_s23 + $0x40] sm:$0xff]  ;;  %v1015_v42 = vld [vmem:[%s2016_s23 + $0x50] sm:$0xff] }
  0x21   : > { %v2075_v39 = vld [vmem:[%s1930_s22 + $0x61] sm:$0xff]  ;;  %v2086_v43 = vld [vmem:[%s1930_s22 + $0x71] sm:$0xff] }
  0x22   : > { %1669 = vmatmul.msk.f32.gmra.mxu0 %vm690_vm1, %v1999_v17  ;;  %1677 = vmatmul.msk.f32.vlgmr.msrb.gmra.mxu1 %vm690_vm1, %v760_v18  ;;  %v766_v41 = vld [vmem:[%s1989_s15 + $0x60] sm:$0xff]  ;;  %v767_v45 = vld [vmem:[%s1989_s15 + $0x70] sm:$0xff] }
  0x23   : > { %1688 = vmatmul.msk.f32.gmra.mxu2 %vm690_vm1, %v2003_v19  ;;  %1697 = vmatmul.msk.f32.vlgmr.msrb.gmra.mxu3 %vm690_vm1, %v924_v20  ;;  %v930_v44 = vld [vmem:[%s1996_s18 + $0x60] sm:$0xff]  ;;  %v931_v47 = vld [vmem:[%s1996_s18 + $0x70] sm:$0xff] }
  0x24   : > { %1748 = vmatpush.msk.msrb.mxu3 %vm715_vm0, %v1726_v5  ;;  %v1016_v46 = vld [vmem:[%s2016_s23 + $0x60] sm:$0xff]  ;;  %v1017_v49 = vld [vmem:[%s2016_s23 + $0x70] sm:$0xff] }
  0x25   : > { %v1177_v48 = vld [vmem:[%s606_s9] sm:$0xff]  ;;  %v670_v53 = vld [vmem:[%s1996_s18 + $0x11] sm:$0xff] }
  0x26   : > { %v669_v50 = vld [vmem:[%s1996_s18 + $0x1] sm:$0xff]  ;;  %v672_v55 = vld [vmem:[%s1996_s18 + $0x31] sm:$0xff] }
  0x27   : > { %v1174_v51 = vld [vmem:[%s572_s10] sm:$0xff]  ;;  %v674_v57 = vld [vmem:[%s1996_s18 + $0x51] sm:$0xff] }
  0x28   : > { %v1232_v52 = vld [vmem:[%s572_s10 + $0x1] sm:$0xff]  ;;  %v676_v1 = vld [vmem:[%s1996_s18 + $0x71] sm:$0xff] }
  0x29   : > { %v671_v54 = vld [vmem:[%s1996_s18 + $0x21] sm:$0xff] }
  0x2a   : > { %1678 = vmatmul.msk.f32.gmra.mxu1 %vm690_vm1, %v2020_v21  ;;  %1707 = vmatmul.msk.f32.vlgmr.msrb.gmra.mxu0 %vm690_vm1, %v1010_v22  ;;  %v673_v56 = vld [vmem:[%s1996_s18 + $0x41] sm:$0xff] }
  0x2b   : > { %1689 = vmatmul.msk.f32.gmra.mxu2 %vm690_vm1, %v2024_v23  ;;  %1698 = vmatmul.msk.f32.gmra.mxu3 %vm690_vm1, %v925_v24  ;;  %v675_v60 = vld [vmem:[%s1996_s18 + $0x61] sm:$0xff] }
  0x32   : > { %1679 = vmatmul.msk.f32.gmra.mxu1 %vm690_vm1, %v2034_v25  ;;  %1708 = vmatmul.msk.f32.gmra.mxu0 %vm690_vm1, %v1011_v26 }
  0x33   : > { %1690 = vmatmul.msk.f32.gmra.mxu2 %vm690_vm1, %v2038_v27  ;;  %1699 = vmatmul.msk.f32.gmra.mxu3 %vm690_vm1, %v926_v28 }
  0x3a   : > { %1680 = vmatmul.msk.f32.gmra.mxu1 %vm690_vm1, %v2048_v29  ;;  %1709 = vmatmul.msk.f32.gmra.mxu0 %vm690_vm1, %v1012_v30 }
  0x3b   : > { %1691 = vmatmul.msk.f32.gmra.mxu2 %vm690_vm1, %v2052_v31  ;;  %1700 = vmatmul.msk.f32.gmra.mxu3 %vm690_vm1, %v927_v32 }
  0x42   : > { %1681 = vmatmul.msk.f32.gmra.mxu1 %vm690_vm1, %v764_v33  ;;  %1710 = vmatmul.msk.f32.gmra.mxu0 %vm690_vm1, %v1013_v34 }
  0x43   : > { %1692 = vmatmul.msk.f32.gmra.mxu2 %vm690_vm1, %v2064_v35  ;;  %1701 = vmatmul.msk.f32.gmra.mxu3 %vm690_vm1, %v928_v36 }
  0x4a   : > { %1682 = vmatmul.msk.f32.gmra.mxu1 %vm690_vm1, %v765_v37  ;;  %1711 = vmatmul.msk.f32.gmra.mxu0 %vm690_vm1, %v1014_v38 }
  0x4b   : > { %1693 = vmatmul.msk.f32.gmra.mxu2 %vm690_vm1, %v2075_v39  ;;  %1702 = vmatmul.msk.f32.gmra.mxu3 %vm690_vm1, %v929_v40 }
  0x52   : > { %1683 = vmatmul.msk.f32.gmra.mxu1 %vm690_vm1, %v766_v41  ;;  %1712 = vmatmul.msk.f32.gmra.mxu0 %vm690_vm1, %v1015_v42 }
  0x53   : > { %1694 = vmatmul.msk.f32.gmra.mxu2 %vm690_vm1, %v2086_v43  ;;  %1703 = vmatmul.msk.f32.gmra.mxu3 %vm690_vm1, %v930_v44 }
  0x5a   : > { %1684 = vmatmul.msk.f32.gmra.mxu1 %vm690_vm1, %v767_v45  ;;  %1713 = vmatmul.msk.f32.gmra.mxu0 %vm690_vm1, %v1016_v46 }
  0x5b   : > { %1704 = vmatmul.msk.f32.gmra.mxu3 %vm690_vm1, %v931_v47  ;;  %1728 = vmatmul.msk.f32.vlgmr.msra.gmra.mxu2 %vm690_vm1, %v1177_v48 }
  0x5c   : > { %1756 = vmatpush.msk.msra.mxu2 %vm715_vm0, %v1938_v6 }
  0x62   : > { %1714 = vmatmul.msk.f32.gmra.mxu0 %vm690_vm1, %v1017_v49  ;;  %1717 = vmatmul.msk.f32.vlgmr.msra.gmra.mxu1 %vm690_vm1, %v669_v50 }
  0x63   : > { %1730 = vmatmul.msk.f32.vlgmr.msra.gmra.mxu3 %vm690_vm1, %v1174_v51  ;;  %1733 = vmatmul.msk.f32.vlgmr.msrb.gmra.mxu2 %vm690_vm1, %v1232_v52 }
  0x6a   : > { %1718 = vmatmul.msk.f32.gmra.mxu1 %vm690_vm1, %v670_v53  ;;  %1765 = vmatmul.msk.f32.vlgmr.msra.gmra.mxu0 %vm690_vm1, %v2003_v19 }
  0x6b   : > { %1749 = vmatmul.msk.f32.vlgmr.msrb.gmra.mxu3 %vm690_vm1, %v2020_v21  ;;  %1757 = vmatmul.msk.f32.vlgmr.msra.gmra.mxu2 %vm690_vm1, %v1965_v12 }
  0x72   : > { %1719 = vmatmul.msk.f32.gmra.mxu1 %vm690_vm1, %v671_v54  ;;  %1766 = vmatmul.msk.f32.gmra.mxu0 %vm690_vm1, %v2024_v23 }
  0x73   : > { %1750 = vmatmul.msk.f32.gmra.mxu3 %vm690_vm1, %v2034_v25  ;;  %1758 = vmatmul.msk.f32.gmra.mxu2 %vm690_vm1, %v1999_v17 }
  0x7a   : > { %1720 = vmatmul.msk.f32.gmra.mxu1 %vm690_vm1, %v672_v55  ;;  %1767 = vmatmul.msk.f32.gmra.mxu0 %vm690_vm1, %v2038_v27 }
  0x7b   : > { %1751 = vmatmul.msk.f32.gmra.mxu3 %vm690_vm1, %v2048_v29  ;;  %1759 = vmatmul.msk.f32.gmra.mxu2 %vm690_vm1, %v1942_v8 }
  0x82   : > { %1721 = vmatmul.msk.f32.gmra.mxu1 %vm690_vm1, %v673_v56  ;;  %1768 = vmatmul.msk.f32.gmra.mxu0 %vm690_vm1, %v2052_v31 }
  0x83   : > { %1752 = vmatmul.msk.f32.gmra.mxu3 %vm690_vm1, %v764_v33  ;;  %1760 = vmatmul.msk.f32.gmra.mxu2 %vm690_vm1, %v1968_v13 }
  0x8a   : > { %1722 = vmatmul.msk.f32.gmra.mxu1 %vm690_vm1, %v674_v57  ;;  %1769 = vmatmul.msk.f32.gmra.mxu0 %vm690_vm1, %v2064_v35 }
  0x8b   : > { %1753 = vmatmul.msk.f32.gmra.mxu3 %vm690_vm1, %v765_v37  ;;  %1761 = vmatmul.msk.f32.gmra.mxu2 %vm690_vm1, %v1945_v9 }
  0x8f   : > { %v736_v58 = vpop.f32.mrf.mxu0  ;;  %v745_v59 = vpop.f32.mrf.mxu1 }
  0x90   : > { %v737_v3 = vadd.f32 %v2171_v2, %v736_v58  ;;  %v746_v26 = vadd.f32 %v2171_v2, %v745_v59 }
  0x92   : > { %1723 = vmatmul.msk.f32.gmra.mxu1 %vm690_vm1, %v675_v60  ;;  %1770 = vmatmul.msk.f32.gmra.mxu0 %vm690_vm1, %v2075_v39 }
  0x93   : > { %1754 = vmatmul.msk.f32.gmra.mxu3 %vm690_vm1, %v766_v41  ;;  %1762 = vmatmul.msk.f32.gmra.mxu2 %vm690_vm1, %v1951_v10 }
  0x96   : > { %v751_v61 = vpop.f32.mrf.mxu2  ;;  %v754_v62 = vpop.f32.mrf.mxu3 }
  0x97   : > { %v739_v63 = vpop.f32.mrf.mxu0  ;;  %v748_v0 = vpop.f32.mrf.mxu1  ;;  %v752_v42 = vadd.f32 %v2171_v2, %v751_v61  ;;  %v755_v50 = vadd.f32 %v2171_v2, %v754_v62 }
  0x98   : > { %v740_v10 = vadd.f32 %v2171_v2, %v739_v63  ;;  %v749_v34 = vadd.f32 %v2171_v2, %v748_v0 }
  0x9a   : > { %1724 = vmatmul.msk.f32.gmra.mxu1 %vm690_vm1, %v676_v1  ;;  %1771 = vmatmul.msk.f32.gmra.mxu0 %vm690_vm1, %v2086_v43 }
  0x9b   : > { %1755 = vmatmul.msk.f32.gmra.mxu3 %vm690_vm1, %v767_v45  ;;  %1763 = vmatmul.msk.f32.gmra.mxu2 %vm690_vm1, %v1974_v15 }
  0x9e   : > { %v2174_v4 = vpop.f32.mrf.mxu3  ;;  %v892_v5 = vpop.f32.mrf.mxu2 }
  0x9f   : > { %v742_v6 = vpop.f32.mrf.mxu0  ;;  %v814_v7 = vpop.f32.mrf.mxu1 }
  0xa0   : > { %v838_v8 = vadd.f32 %v814_v7, %v737_v3  ;;  %v743_v18 = vadd.f32 %v2171_v2, %v742_v6 }
  0xa2   : > { %v916_v9 = vadd.f32 %v892_v5, %v838_v8 }
  0xa6   : > { %v895_v11 = vpop.f32.mrf.mxu2  ;;  %v978_v12 = vpop.f32.mrf.mxu3 }
  0xa7   : > { %v1002_v13 = vadd.f32 %v978_v12, %v916_v9  ;;  %v817_v14 = vpop.f32.mrf.mxu1  ;;  %v1064_v15 = vpop.f32.mrf.mxu0 }
  0xa8   : > { %v839_v16 = vadd.f32 %v817_v14, %v740_v10 }
  0xaa   : > { %v917_v17 = vadd.f32 %v895_v11, %v839_v16  ;;  %v1088_v11 = vadd.f32 %v1064_v15, %v1002_v13 }
  0xae   : > { %v898_v19 = vpop.f32.mrf.mxu2  ;;  %v981_v20 = vpop.f32.mrf.mxu3 }
  0xaf   : > { %v2178_v21 = vadd.f32 %v981_v20, %v917_v17  ;;  %v820_v22 = vpop.f32.mrf.mxu1  ;;  %v1067_v23 = vpop.f32.mrf.mxu0 }
  0xb0   : > { %v840_v24 = vadd.f32 %v820_v22, %v743_v18 }
  0xb1   : > { %v1089_v13 = vadd.f32 %v1067_v23, %v2178_v21 }
  0xb2   : > { %v918_v25 = vadd.f32 %v898_v19, %v840_v24 }
  0xb6   : > { %v901_v27 = vpop.f32.mrf.mxu2  ;;  %v984_v28 = vpop.f32.mrf.mxu3 }
  0xb7   : > { %v2181_v29 = vadd.f32 %v984_v28, %v918_v25  ;;  %v823_v30 = vpop.f32.mrf.mxu1  ;;  %v2183_v31 = vpop.f32.mrf.mxu0 }
  0xb8   : > { %v841_v32 = vadd.f32 %v823_v30, %v746_v26 }
  0xba   : > { %v919_v33 = vadd.f32 %v901_v27, %v841_v32 }
  0xbe   : > { %v904_v35 = vpop.f32.mrf.mxu2  ;;  %v987_v36 = vpop.f32.mrf.mxu3 }
  0xbf   : > { %v2186_v37 = vadd.f32 %v987_v36, %v919_v33  ;;  %v826_v38 = vpop.f32.mrf.mxu1  ;;  %v2188_v39 = vpop.f32.mrf.mxu0  ;;  %v1090_v33 = vadd.f32 %v2183_v31, %v2181_v29  ;;  %v758_v29 = vadd.f32 %v2171_v2, %v2174_v4 }
  0xc0   : > { %v842_v40 = vadd.f32 %v826_v38, %v749_v34 }
  0xc2   : > { %v920_v41 = vadd.f32 %v904_v35, %v842_v40 }
  0xc6   : > { %v907_v43 = vpop.f32.mrf.mxu2  ;;  %v990_v44 = vpop.f32.mrf.mxu3 }
  0xc7   : > { %v2191_v45 = vadd.f32 %v990_v44, %v920_v41  ;;  %v829_v46 = vpop.f32.mrf.mxu1  ;;  %v2193_v47 = vpop.f32.mrf.mxu0 }
  0xc8   : > { %v843_v48 = vadd.f32 %v829_v46, %v752_v42  ;;  %v1091_v42 = vadd.f32 %v2188_v39, %v2186_v37 }
  0xca   : > { %v921_v49 = vadd.f32 %v907_v43, %v843_v48 }
  0xce   : > { %v910_v51 = vpop.f32.mrf.mxu2  ;;  %v993_v52 = vpop.f32.mrf.mxu3 }
  0xcf   : > { %v2196_v53 = vadd.f32 %v993_v52, %v921_v49  ;;  %v832_v54 = vpop.f32.mrf.mxu1  ;;  %v2198_v55 = vpop.f32.mrf.mxu0 }
  0xd0   : > { %v844_v56 = vadd.f32 %v832_v54, %v755_v50  ;;  %v1092_v54 = vadd.f32 %v2193_v47, %v2191_v45 }
  0xd1   : > { %v1093_v45 = vadd.f32 %v2198_v55, %v2196_v53 }
  0xd2   : > { %v922_v57 = vadd.f32 %v910_v51, %v844_v56 }
  0xd6   : > { %v913_v58 = vpop.f32.mrf.mxu2  ;;  %v996_v59 = vpop.f32.mrf.mxu3 }
  0xd7   : > { %v2200_v60 = vadd.f32 %v996_v59, %v922_v57  ;;  %v835_v61 = vpop.f32.mrf.mxu1  ;;  %v2202_v63 = vpop.f32.mrf.mxu0 }
  0xd8   : > { %v845_v50 = vadd.f32 %v835_v61, %v758_v29 }
  0xd9   : > { %v1094_v53 = vadd.f32 %v2202_v63, %v2200_v60 }
  0xda   : > { %v923_v39 = vadd.f32 %v913_v58, %v845_v50 }
  0xde   : > { %v999_v0 = vpop.f32.mrf.mxu3  ;;  %v1203_v1 = vpop.f32.mrf.mxu2 }
  0xdf   : > { %v2204_v62 = vpop.f32.mrf.mxu0  ;;  %v1142_v3 = vpop.f32.mrf.mxu1 }
  0xe0   : > { %v1166_v17 = vadd.f32 %v1142_v3, %v1088_v11  ;;  %v1009_v3 = vadd.f32 %v999_v0, %v923_v39 }
  0xe2   : > { %v1095_v4 = vadd.f32 %v2204_v62, %v1009_v3 }
  0xe6   : > { %v1229_v5 = vpop.f32.mrf.mxu3  ;;  %v2206_v6 = vpop.f32.mrf.mxu2 }
  0xe7   : > { %v1145_v7 = vpop.f32.mrf.mxu1  ;;  %v1413_v8 = vpop.f32.mrf.mxu0  ;;  %v1230_v2 = vadd.f32 %v1229_v5, %v1203_v1 }
  0xe8   : > { %v1167_v26 = vadd.f32 %v1145_v7, %v1089_v13 }
  0xe9   : > { %v1261_v58 = vadd.f32 %v2206_v6, %v1230_v2 }
  0xee   : > { %v1316_v9 = vpop.f32.mrf.mxu3  ;;  %v1375_v10 = vpop.f32.mrf.mxu2 }
  0xef   : > { %v1376_v12 = vadd.f32 %v1375_v10, %v1316_v9  ;;  %v1148_v14 = vpop.f32.mrf.mxu1  ;;  %v1416_v16 = vpop.f32.mrf.mxu0 }
  0xf0   : > { %v1168_v38 = vadd.f32 %v1148_v14, %v1090_v33 }
  0xf1   : > { %v1434_v18 = vadd.f32 %v1413_v8, %v1376_v12 }
  0xf3   : > { %v1441_v19 = vadd.f32 %v1434_v18, %v1166_v17 }
  0xf5   : > { %1449 = vst.msk [vmem:[%s2212_s16] sm:$0xff] %vm690_vm1, %v1441_v19 }
  0xf6   : > { %v1319_v20 = vpop.f32.mrf.mxu3  ;;  %v1378_v22 = vpop.f32.mrf.mxu2 }
  0xf7   : > { %v1379_v15 = vadd.f32 %v1378_v22, %v1319_v20  ;;  %v1151_v24 = vpop.f32.mrf.mxu1  ;;  %v1419_v25 = vpop.f32.mrf.mxu0 }
  0xf8   : > { %v1169_v46 = vadd.f32 %v1151_v24, %v1091_v42 }
  0xf9   : > { %v1435_v27 = vadd.f32 %v1416_v16, %v1379_v15 }
  0xfb   : > { %v1442_v28 = vadd.f32 %v1435_v27, %v1167_v26 }
  0xfd   : > { %1450 = vst.msk [vmem:[%s2212_s16 + $0x8] sm:$0xff] %vm690_vm1, %v1442_v28 }
  0xfe   : > { %v1322_v30 = vpop.f32.mrf.mxu3  ;;  %v1381_v32 = vpop.f32.mrf.mxu2 }
  0xff   : > { %v1382_v34 = vadd.f32 %v1381_v32, %v1322_v30  ;;  %v1154_v35 = vpop.f32.mrf.mxu1  ;;  %v1422_v36 = vpop.f32.mrf.mxu0 }
 0x100   : > { %v1170_v57 = vadd.f32 %v1154_v35, %v1092_v54 }
 0x101   : > { %v1436_v21 = vadd.f32 %v1419_v25, %v1382_v34 }
 0x103   : > { %v1443_v23 = vadd.f32 %v1436_v21, %v1168_v38 }
 0x105   : > { %1451 = vst.msk [vmem:[%s2212_s16 + $0x10] sm:$0xff] %vm690_vm1, %v1443_v23 }
 0x106   : > { %v1325_v40 = vpop.f32.mrf.mxu3  ;;  %v1384_v41 = vpop.f32.mrf.mxu2 }
 0x107   : > { %v1385_v43 = vadd.f32 %v1384_v41, %v1325_v40  ;;  %v1157_v44 = vpop.f32.mrf.mxu1  ;;  %v1425_v49 = vpop.f32.mrf.mxu0 }
 0x108   : > { %v1171_v11 = vadd.f32 %v1157_v44, %v1093_v45 }
 0x109   : > { %v1437_v48 = vadd.f32 %v1422_v36, %v1385_v43 }
 0x10b   : > { %v1444_v31 = vadd.f32 %v1437_v48, %v1169_v46 }
 0x10d   : > { %1452 = vst.msk [vmem:[%s2212_s16 + $0x18] sm:$0xff] %vm690_vm1, %v1444_v31 }
 0x10e   : > { %v1328_v51 = vpop.f32.mrf.mxu3  ;;  %v1387_v52 = vpop.f32.mrf.mxu2 }
 0x10f   : > { %v1388_v56 = vadd.f32 %v1387_v52, %v1328_v51  ;;  %v1160_v37 = vpop.f32.mrf.mxu1  ;;  %v1428_v8 = vpop.f32.mrf.mxu0 }
 0x110   : > { %v1172_v17 = vadd.f32 %v1160_v37, %v1094_v53 }
 0x111   : > { %v1438_v59 = vadd.f32 %v1425_v49, %v1388_v56 }
 0x113   : > { %v1445_v7 = vadd.f32 %v1438_v59, %v1170_v57 }
 0x115   : > { %1453 = vst.msk [vmem:[%s2212_s16 + $0x20] sm:$0xff] %vm690_vm1, %v1445_v7 }
 0x116   : > { %v1331_v61 = vpop.f32.mrf.mxu3  ;;  %v1390_v9 = vpop.f32.mrf.mxu2 }
 0x117   : > { %v1391_v47 = vadd.f32 %v1390_v9, %v1331_v61  ;;  %v1163_v10 = vpop.f32.mrf.mxu1  ;;  %v1431_v1 = vpop.f32.mrf.mxu0 }
 0x118   : > { %v1173_v0 = vadd.f32 %v1163_v10, %v1095_v4 }
 0x119   : > { %v1439_v12 = vadd.f32 %v1428_v8, %v1391_v47 }
 0x11a   : > { %v1448_v14 = vadd.f32 %v1261_v58, %v1173_v0 }
 0x11b   : > { %v1446_v16 = vadd.f32 %v1439_v12, %v1171_v11 }
 0x11c   : > { %1772 = vst.msk [vmem:[%s2212_s16 + $0x38] sm:$0xff] %vm690_vm1, %v1448_v14 }
 0x11d   : > { %1454 = vst.msk [vmem:[%s2212_s16 + $0x28] sm:$0xff] %vm690_vm1, %v1446_v16 }
 0x11e   : > { %v1334_v62 = vpop.f32.mrf.mxu3  ;;  %v1393_v5 = vpop.f32.mrf.mxu2 }
 0x11f   : > { %v1394_v55 = vadd.f32 %v1393_v5, %v1334_v62 }
 0x121   : > { %v1440_v18 = vadd.f32 %v1431_v1, %v1394_v55 }
 0x123   : > { %v1447_v6 = vadd.f32 %v1440_v18, %v1172_v17 }
 0x125   : > { %1455 = vst.msk [vmem:[%s2212_s16 + $0x30] sm:$0xff] %vm690_vm1, %v1447_v6 }
 0x126 PF: > { %s18_s29 = sadd.s32 1, %s1833_s29   ;;  %s2263_s27 = smov %s1829_s28 }
 0x127   : > { %p15_p5 = scmp.ge.s32.totalorder %s18_s29, 4   ;;  %s2264_s28 = smov %s2266_s30 }
 0x129   :  { %17 = sbr.rel (!%p15_p5) target bundleno = 2 (0x2), region = 108 }

</bundles_post_ra>
